<compile_context>
chip_gen: v7x
topology: tpu7x:2x2x1
jax: 0.10.0
libtpu: 0.0.40
codegen_flags: <defaults>
</compile_context>

<pallas_src>
import jax
import jax.numpy as jnp
from jax.experimental import pallas as pl
from jax.experimental.pallas import tpu as pltpu


def _make_kernel():
    """Per-(batch, hw-chunk, hw-tile) kernel: 1x1-conv + ReLU + partial sum."""

    def kernel(x_ref, w_ref, o_ref):
        # x_ref: (1, tile_hw, C_aug)  contiguous spatial tile (ones channel appended)
        # w_ref: (C_aug, C_feat)      pointwise-conv weights with the bias row folded in
        # o_ref: (1, 1, C_feat)       resident partial-sum accumulator for this
        #                             (batch, hw-chunk) output block
        t = pl.program_id(2)

        @pl.when(t == 0)
        def _init():
            o_ref[...] = jnp.zeros_like(o_ref)

        # 1x1 conv == channel contraction on the MXU, standard (M,K)x(K,N) form.
        feat = jnp.dot(x_ref[0], w_ref[...],
                       preferred_element_type=jnp.float32)   # (tile_hw, C_feat)
        feat = jnp.maximum(feat, 0.0)                         # ReLU (bias already folded)

        # Partial SUM of the global average pool.  Zero-padded spatial rows are
        # all-zero (including the ones channel) so they contribute exactly 0;
        # no masking path is needed.
        # TODO(synk): if a bundle dump shows the VALU slot saturated, move this
        # reduction onto the idle MXU via ones(1, tile_hw) @ feat.
        o_ref[0] += jnp.sum(feat, axis=0, keepdims=True)

    return kernel


def partial_inception_network(x, w, b, *, tile_hw=None, hw_chunks=None):
    """Synthetic stand-in for PartialInceptionNetwork.forward.

    x: (N, 3, H, W) float32 in [0, 1]
    w: (3, C_feat)  pointwise-conv weights of the stand-in feature extractor
    b: (C_feat,)    bias
    returns: (N, C_feat) float32 globally average-pooled activations.
    """
    N, C_in, H, W = x.shape
    assert C_in == 3, (
        "Expected input shape to be: (N,3,H,W), but got {}".format(x.shape))
    C_feat = w.shape[1]
    HW = H * W

    # Generation-aware defaults: v5e/v6e have 128 MiB VMEM -> bigger tile and a
    # ~96 MiB scoped limit; v7x has only 64 MiB -> cap at 2048 / 48 MiB.
    big_vmem = False
    try:
        big_vmem = pltpu.get_tpu_info().vmem_capacity_bytes >= (100 << 20)
    except Exception:
        pass
    if tile_hw is None:
        tile_hw = 4096 if big_vmem else 2048
    vmem_limit = (96 << 20) if big_vmem else (48 << 20)
    if hw_chunks is None:
        # For odd N one TensorCore would idle on v7x; chunk the HW reduction so
        # both cores get 'parallel' work.  Harmless on 1-TC chips.
        hw_chunks = 2 if (N % 2 == 1) else 1

    # NCHW -> (N, HW, C): each spatial tile is one contiguous HBM descriptor and
    # the in-kernel matmul needs no transposed operand.
    x_l = jnp.transpose(x, (0, 2, 3, 1)).reshape(N, HW, C_in)
    # Fold bias into the matmul: ones channel on x, bias row on w (K: 3 -> 4).
    ones = jnp.ones((N, HW, 1), dtype=x_l.dtype)
    x_aug = jnp.concatenate([x_l, ones], axis=-1)            # (N, HW, 4)
    w_aug = jnp.concatenate([w, b[None, :]], axis=0)         # (4, C_feat)
    c_aug = C_in + 1

    # Spatial tile: multiple of 128, no larger than needed.
    hw_128 = pl.cdiv(HW, 128) * 128
    tile = max(128, (min(tile_hw, hw_128) // 128) * 128)
    tiles_total = pl.cdiv(HW, tile)
    n_chunks = max(1, min(hw_chunks, tiles_total))
    tiles_per_chunk = pl.cdiv(tiles_total, n_chunks)
    hw_pad = n_chunks * tiles_per_chunk * tile

    # Pad the HW axis AFTER appending the ones channel so padded rows are
    # all-zero and drop out of the sum for free.
    if hw_pad != HW:
        x_aug = jnp.pad(x_aug, ((0, 0), (0, hw_pad - HW), (0, 0)))

    kernel = _make_kernel()

    out = pl.pallas_call(
        kernel,
        out_shape=jax.ShapeDtypeStruct((N * n_chunks, 1, C_feat), jnp.float32),
        grid_spec=pltpu.PrefetchScalarGridSpec(
            num_scalar_prefetch=0,
            grid=(N, n_chunks, tiles_per_chunk),        # HW reduction axis last
            in_specs=[
                pl.BlockSpec((1, tile, c_aug),
                             lambda n, c, t: (n, c * tiles_per_chunk + t, 0)),
                pl.BlockSpec((c_aug, C_feat), lambda n, c, t: (0, 0)),
            ],
            out_specs=pl.BlockSpec((1, 1, C_feat),
                                   lambda n, c, t: (n * n_chunks + c, 0, 0)),
        ),
        compiler_params=pltpu.CompilerParams(
            dimension_semantics=("parallel", "parallel", "arbitrary"),
            vmem_limit_bytes=vmem_limit),
    )(x_aug, w_aug)

    # Combine per-chunk partial sums, divide by the TRUE HW (global mean), then
    # .view(N, C_feat) of the (N, C_feat, 1, 1) pooled map.
    pooled = out.reshape(N, n_chunks, C_feat).sum(axis=1) * (1.0 / float(HW))
    return pooled


def _reference(x, w, b):
    """Plain-JAX reference of the same synthetic forward."""
    N, C_in, H, W = x.shape
    x_l = jnp.transpose(x, (0, 2, 3, 1)).reshape(N, H * W, C_in)
    feat = jnp.einsum("nsc,cf->nsf", x_l, w) + b[None, None, :]
    feat = jnp.maximum(feat, 0.0)
    return jnp.mean(feat, axis=1)


if __name__ == "__main__":
    # Small-shape stand-ins: real model is (N, 3, 299, 299) -> (N, 2048);
    # here we use (N, 3, 16, 16) / (N, 3, 17, 17) -> (N, 256).
    N, C_in, C_feat = 2, 3, 256

    key = jax.random.PRNGKey(0)
    kx1, kx2, kw, kb = jax.random.split(key, 4)

    # Case 1: HW = 256 (multiple of 128, no padding).
    x1 = jax.random.uniform(kx1, (N, C_in, 16, 16), dtype=jnp.float32)
    # Case 2: HW = 289 exercises the zero-padded remainder (analogous to
    # 299*299 = 89401 at the real shape).
    x2 = jax.random.uniform(kx2, (N, C_in, 17, 17), dtype=jnp.float32)

    w = jax.random.normal(kw, (C_in, C_feat), dtype=jnp.float32) * 0.1
    b = jax.random.normal(kb, (C_feat,), dtype=jnp.float32) * 0.01

    cases = [
        (x1, {}),                                  # single tile, defaults
        (x1, {"tile_hw": 128}),                    # multi-tile accumulation
        (x2, {"tile_hw": 128}),                    # zero-padded last tile
        (x2, {"tile_hw": 128, "hw_chunks": 2}),    # chunk-parallel HW reduction
        (x2[:1], {"tile_hw": 128}),                # odd N -> auto 2 chunks
    ]
    for x, kwargs in cases:
        acts = jax.block_until_ready(partial_inception_network(x, w, b, **kwargs))
        assert acts.shape == (x.shape[0], C_feat), acts.shape
        assert acts.dtype == jnp.float32
        ref = _reference(x, w, b)
        assert jnp.allclose(acts, ref, atol=1e-5, rtol=1e-5), "mismatch vs reference"

    print("KERNEL_OK")
</pallas_src>

<mosaic_0001>
module attributes {stable_mosaic.version = 11 : i64} {
  func.func @kernel(%arg0: i32, %arg1: i32, %arg2: i32, %arg3: memref<1x256x4xf32, #tpu.memory_space<vmem>>, %arg4: memref<4x256xf32, #tpu.memory_space<vmem>>, %arg5: memref<1x1x256xf32, #tpu.memory_space<vmem>>) attributes {dimension_semantics = [#tpu.dimension_semantics<parallel>, #tpu.dimension_semantics<parallel>, #tpu.dimension_semantics<arbitrary>], iteration_bounds = array<i64: 2, 1, 1>, scalar_prefetch = 0 : i64, scratch_operands = 0 : i64, tpu.core_type = #tpu.core_type<tc>, window_params = [{transform_indices = @transform_0, window_bounds = array<i64: 1, 256, 4>}, {pipeline_mode = #tpu.pipeline_mode<synchronous>, transform_indices = @transform_1, window_bounds = array<i64: 4, 256>}, {transform_indices = @transform_2, window_bounds = array<i64: 1, 1, 256>}]} {
    %c0_i32 = arith.constant 0 : i32
    %0 = arith.cmpi eq, %arg2, %c0_i32 : i32
    %1 = arith.extui %0 : i1 to i32
    %c0_i32_0 = arith.constant 0 : i32
    %2 = arith.cmpi ne, %1, %c0_i32_0 : i32
    scf.if %2 {
      %cst_13 = arith.constant 0.000000e+00 : f32
      %17 = vector.broadcast %cst_13 : f32 to vector<1x1x256xf32>
      %c0_14 = arith.constant 0 : index
      %c0_15 = arith.constant 0 : index
      %c0_16 = arith.constant 0 : index
      %18 = vector.load %arg5[%c0_14, %c0_15, %c0_16] : memref<1x1x256xf32, #tpu.memory_space<vmem>>, vector<1x1x256xf32>
      tpu.vector_store %arg5[%c0_14, %c0_15, %c0_16], %17 {strides = array<i32>} : memref<1x1x256xf32, #tpu.memory_space<vmem>>, vector<1x1x256xf32>,
    } else {
    }
    %c0 = arith.constant 0 : index
    %c0_1 = arith.constant 0 : index
    %c0_2 = arith.constant 0 : index
    %3 = vector.load %arg3[%c0, %c0_1, %c0_2] : memref<1x256x4xf32, #tpu.memory_space<vmem>>, vector<1x256x4xf32>
    %4 = vector.shape_cast %3 : vector<1x256x4xf32> to vector<256x4xf32>
    %c0_3 = arith.constant 0 : index
    %c0_4 = arith.constant 0 : index
    %5 = vector.load %arg4[%c0_3, %c0_4] : memref<4x256xf32, #tpu.memory_space<vmem>>, vector<4x256xf32>
    %cst = arith.constant dense<0.000000e+00> : vector<256x256xf32>
    %6 = tpu.matmul %4, %5, %cst {dimension_numbers = #tpu.dot_dimension_numbers<[1], [0], [0], [1], [0, 0, 1, 1], [], []>} : vector<256x4xf32>, vector<4x256xf32>, vector<256x256xf32> -> vector<256x256xf32>
    %cst_5 = arith.constant 0.000000e+00 : f32
    %7 = vector.broadcast %cst_5 : f32 to vector<256x256xf32>
    %8 = arith.maximumf %6, %7 : vector<256x256xf32>
    %c0_6 = arith.constant 0 : index
    %c0_7 = arith.constant 0 : index
    %c0_8 = arith.constant 0 : index
    %9 = vector.load %arg5[%c0_6, %c0_7, %c0_8] : memref<1x1x256xf32, #tpu.memory_space<vmem>>, vector<1x1x256xf32>
    %10 = vector.shape_cast %9 : vector<1x1x256xf32> to vector<1x256xf32>
    %cst_9 = arith.constant dense<0.000000e+00> : vector<256xf32>
    %11 = vector.multi_reduction <add>, %8, %cst_9 [0] : vector<256x256xf32> to vector<256xf32>
    %12 = vector.shape_cast %11 : vector<256xf32> to vector<1x256xf32>
    %13 = arith.addf %10, %12 : vector<1x256xf32>
    %c0_10 = arith.constant 0 : index
    %c0_11 = arith.constant 0 : index
    %c0_12 = arith.constant 0 : index
    %14 = vector.load %arg5[%c0_10, %c0_11, %c0_12] : memref<1x1x256xf32, #tpu.memory_space<vmem>>, vector<1x1x256xf32>
    %15 = vector.shape_cast %14 : vector<1x1x256xf32> to vector<1x256xf32>
    %16 = vector.shape_cast %13 : vector<1x256xf32> to vector<1x1x256xf32>
    tpu.vector_store %arg5[%c0_10, %c0_11, %c0_12], %16 {strides = array<i32>} : memref<1x1x256xf32, #tpu.memory_space<vmem>>, vector<1x1x256xf32>,
    return
  }
  func.func @transform_0(%arg0: i32, %arg1: i32, %arg2: i32) -> (i32, i32, i32) {
    %c1_i32 = arith.constant 1 : i32
    %0 = arith.muli %arg1, %c1_i32 : i32
    %1 = arith.addi %0, %arg2 : i32
    %c0_i32 = arith.constant 0 : i32
    %c0_i32_0 = arith.constant 0 : i32
    return %arg0, %1, %c0_i32 : i32, i32, i32
  }
  func.func @transform_1(%arg0: i32, %arg1: i32, %arg2: i32) -> (i32, i32) {
    %c0_i32 = arith.constant 0 : i32
    %c0_i32_0 = arith.constant 0 : i32
    %c0_i32_1 = arith.constant 0 : i32
    return %c0_i32, %c0_i32_0 : i32, i32
  }
  func.func @transform_2(%arg0: i32, %arg1: i32, %arg2: i32) -> (i32, i32, i32) {
    %c1_i32 = arith.constant 1 : i32
    %0 = arith.muli %arg0, %c1_i32 : i32
    %1 = arith.addi %0, %arg1 : i32
    %c0_i32 = arith.constant 0 : i32
    %c0_i32_0 = arith.constant 0 : i32
    %c0_i32_1 = arith.constant 0 : i32
    return %1, %c0_i32, %c0_i32_0 : i32, i32, i32
  }
}

</mosaic_0001>

<bundles_post_ra>
// kernel: tpu_custom_call.1
= control target key start
LH: loop header
LB: loop body
LE: loop exit
PB: predicated region body
PF: predicated region fallthrough
CT: control target
= control target key end

     0   :  { %7 = vsyncpa [#allocation3], 0  ;;  %s1383_s0 = inlined_call_operand.vmem [shape: f32[2,256,4], index: 0, kind: input, shape index: {}]   ;;  %s1384_s1 = inlined_call_operand.vmem [shape: f32[4,256], index: 1, kind: input, shape index: {}]   ;;  %s1385_s2 = inlined_call_operand.hbm [shape: f32[2,1,256], index: 2, kind: output, shape index: {}]  }
   0x1   :  { %9 = vsyncpa [#allocation3 + $0x1], 0  ;;  %s1053_s9 = smov 0   ;;  %s1055_s10 = smov 0  }
   0x2   :  { %s1057_s11 = smov 0   ;;  %s1059_s12 = smov 0  }
   0x3   :  { %s1061_s13 = smov 0   ;;  %s1063_s14 = smov 0  }
   0x4 LB: > { %s846_s15 = sadd.s32 4294967295, %s1033_s14   ;;  %s847_s16 = sadd.s32 4294967294, %s1033_s14   ;;  %s1033_s14 = sphi %s1063_s14, %s15_s14   ;;  %s1029_s13 = sphi %s1061_s13, %s1394_s13   ;;  %s1025_s12 = sphi %s1059_s12, %s1393_s12   ;;  %s1021_s11 = sphi %s1057_s11, %s1392_s11   ;;  %s1017_s10 = sphi %s1055_s10, %s1391_s10   ;;  %s1013_s9 = sphi %s1053_s9, %s1390_s9  }
   0x5   : > { %s34_s17 = sadd.s32 1, %s1029_s13  ;;  %s94_s18 = sadd.s32 1, %s1021_s11 }
   0x6   : > { %p36_p0 = scmp.ge.s32.totalorder %s34_s17, 2  ;;  %p104_p1 = scmp.ne.s32.totalorder %s1021_s11, %s1017_s10 }
   0x7   : > { %p105_p2 = scmp.eq.s32.totalorder %s846_s15, 1  ;;  %p110_p3 = scmp.ne.s32.totalorder %s1017_s10, %s1013_s9 }
   0x8   : > { %s1396_s17 = smov (%p36_p0, %s34_s17), 0  ;;  %p111_p5 = scmp.eq.s32.totalorder %s847_s16, 1 }
   0x9   : > { %p1093_p4 = por %p105_p2, %p104_p1  ;;  %s91_s20 = ssub.s32 %s1029_s13, %s1396_s17 }
   0xa   : > { %p850_p6 = scmp.ge.s32.totalorder %s1033_s14, 1  ;;  %p92_p7 = scmp.eq.s32.totalorder %s91_s20, 0 }
   0xb   : > { %p1100_p8 = por %p111_p5, %p110_p3  ;;  %p147_p9 = scmp.lt.s32.totalorder %s1033_s14, 3 }
   0xc   : > { %s1106_s22 = scalar_select %p92_p7, %s1021_s11, %s94_s18  }
   0xd   : > { %p148_p10 = pnand %p850_p6, %p147_p9 }
   0xe   : > { %v228_v0 = vld [vmem:[%s1384_s1] sm:$0xff] (!%p148_p10)  ;;  %vm328_vm0 = vcmask (!%p148_p10), 1043456   ;;  %p176_p11 = scmp.lt.s32.totalorder (!%p148_p10), %s1025_s12, 1  ;;  %v1035_v2 = vmov (!%p148_p10), 0.0   ;;  %vm231_vm1 = vcmask (!%p148_p10), 31744   ;;  %v191_v35 = vlaneseq (!%p148_p10)  ;;  %s171_s30 = sand.u32 (!%p148_p10), 1, %s1017_s10  }
   0xf   : > { %151 = sbr.rel (%p148_p10) target bundleno = 370 (0x172), region = 28  ;;  %v230_v1 = vcombine.high (!%p148_p10), %v228_v0, %v228_v0  ;;  %397 = vmatprep.mubr.f32.mxu0 (!%p148_p10), %v1035_v2  ;;  %493 = vmatprep.mubr.f32.mxu1 (!%p148_p10), %v1035_v2  ;;  %s851_s3 = sshll.u32 (!%p148_p10), %s171_s30, 1 }
  0x10   : > { %vm1218_vm2 = vcmp.lt.s32.totalorder (!%p148_p10), %v191_v35, 256  ;;  %s1222_s4 = scalar_lea.vmem (!%p148_p10), [#allocation2], %s851_s3  ;;  %s894_s5 = sshll.u32 (!%p148_p10), %s1025_s12, 5 }
  0x11   : > { %854 = vmatprep.subr.msk.mxu0 (!%p148_p10), %vm328_vm0, %v230_v1  ;;  %895 = vmatprep.subr.msk.mxu1 (!%p148_p10), %vm328_vm0, %v230_v1  ;;  %195 = vst.msk [vmem:[%s1222_s4] sm:$0x3] (!%p148_p10), %vm1218_vm2, %v1035_v2  ;;  %s769_s6 = sshll.u32 (!%p148_p10), %s1222_s4, 4  ;;  %s1331_s15 = scalar_lea.hbm (!%p148_p10), %s1385_s2, %s894_s5  ;;  %s1333_s6 = int_to_ptr.vmem [resolvable:$true] %s769_s6 }
  0x12   : > { %855 = vmatpush1.msk.msra.mxu0 (!%p148_p10), %vm328_vm0, %v228_v0  ;;  %896 = vmatpush1.msk.msra.mxu1 (!%p148_p10), %vm328_vm0, %v228_v0  ;;  %s754_s16 = scalar_lea.sflag (!%p148_p10), [#allocation3], %s171_s30  ;;  %s955_s18 = scalar_lea.vmem (!%p148_p10), %s1333_s6, 32 }
  0x13   : > { %p956_p12 = scmp.ne.s32.totalorder (!%p148_p10), %s1333_s6, %s955_s18 }
  0x15   : > { %p957_p13 = pnand (!%p148_p10), %p956_p12, %p1093_p4 }
  0x16   : > { %s177_s25 = scalar_select %p176_p11, %s1025_s12, 1 }
  0x17   : > { %p958_p0 = pneg %p957_p13  ;;  %s1037_s12 = smov [#allocation2]  }
  0x18   : > { %s893_s26 = sshll.u32 %s177_s25, 8  ;;  %s959_s20 = sshll.u32 %s1037_s12, 4  ;;  %s960_s20 = int_to_ptr.vmem [resolvable:$false] %s959_s20 }
  0x19   : > { %s1118_s29 = scalar_lea.vmem %s1383_s0, %s893_s26  ;;  %s961_s23 = scalar_lea.vmem %s960_s20, 64 }
  0x1a   : > { %v196_v3 = vld [vmem:[%s1118_s29] sm:$0xff]  ;;  %v197_v4 = vld [vmem:[%s1118_s29 + $0x8] sm:$0xff]  ;;  %v198_v7 = vld [vmem:[%s1118_s29 + $0x10] sm:$0xff]  ;;  %p962_p1 = scmp.lt.s32.totalorder %s1333_s6, %s960_s20  ;;  %p963_p2 = scmp.lt.s32.totalorder %s961_s23, %s955_s18 }
  0x1b   : > { %856 = vmatmul.mubr.msk.f32.vlgmr.msra.gmra.mrb[0].mxu0 %vm231_vm1, %v196_v3  ;;  %v212_v5 = vld [vmem:[%s1118_s29 + $0x80] sm:$0xff]  ;;  %v213_v6 = vld [vmem:[%s1118_s29 + $0x88] sm:$0xff]  ;;  %v214_v8 = vld [vmem:[%s1118_s29 + $0x90] sm:$0xff] }
  0x1c   : > { %403 = vmatprep.mubr.f32.mxu0 %v1035_v2  ;;  %872 = vmatmul.mubr.msk.f32.vlgmr.msra.gmra.mrb[0].mxu1 %vm231_vm1, %v212_v5  ;;  %v199_v9 = vld [vmem:[%s1118_s29 + $0x18] sm:$0xff]  ;;  %v200_v11 = vld [vmem:[%s1118_s29 + $0x20] sm:$0xff]  ;;  %v201_v13 = vld [vmem:[%s1118_s29 + $0x28] sm:$0xff]  ;;  %p964_p3 = por %p963_p2, %p962_p1 }
  0x1d   : > { %499 = vmatprep.mubr.f32.mxu1 %v1035_v2  ;;  %v215_v10 = vld [vmem:[%s1118_s29 + $0x98] sm:$0xff]  ;;  %v216_v12 = vld [vmem:[%s1118_s29 + $0xa0] sm:$0xff]  ;;  %v217_v14 = vld [vmem:[%s1118_s29 + $0xa8] sm:$0xff] }
  0x1e   : > { %v202_v15 = vld [vmem:[%s1118_s29 + $0x30] sm:$0xff]  ;;  %v203_v17 = vld [vmem:[%s1118_s29 + $0x38] sm:$0xff]  ;;  %v204_v19 = vld [vmem:[%s1118_s29 + $0x40] sm:$0xff]  ;;  %p965_p5 = pnand %p964_p3, %p958_p0 }
  0x1f   : > { %857 = vmatmul.mubr.msk.f32.gmra.mrb[2].mxu0 %vm231_vm1, %v197_v4  ;;  %v218_v16 = vld [vmem:[%s1118_s29 + $0xb0] sm:$0xff]  ;;  %v219_v18 = vld [vmem:[%s1118_s29 + $0xb8] sm:$0xff]  ;;  %v220_v20 = vld [vmem:[%s1118_s29 + $0xc0] sm:$0xff] }
  0x20   : > { %409 = vmatprep.mubr.f32.mxu0 %v1035_v2  ;;  %873 = vmatmul.mubr.msk.f32.gmra.mrb[2].mxu1 %vm231_vm1, %v213_v6  ;;  %v205_v21 = vld [vmem:[%s1118_s29 + $0x48] sm:$0xff]  ;;  %v206_v23 = vld [vmem:[%s1118_s29 + $0x50] sm:$0xff]  ;;  %v207_v25 = vld [vmem:[%s1118_s29 + $0x58] sm:$0xff] }
  0x21   : > { %505 = vmatprep.mubr.f32.mxu1 %v1035_v2  ;;  %v221_v22 = vld [vmem:[%s1118_s29 + $0xc8] sm:$0xff]  ;;  %v222_v24 = vld [vmem:[%s1118_s29 + $0xd0] sm:$0xff]  ;;  %v223_v26 = vld [vmem:[%s1118_s29 + $0xd8] sm:$0xff] }
  0x22   : > { %v208_v27 = vld [vmem:[%s1118_s29 + $0x60] sm:$0xff]  ;;  %v209_v29 = vld [vmem:[%s1118_s29 + $0x68] sm:$0xff]  ;;  %v210_v31 = vld [vmem:[%s1118_s29 + $0x70] sm:$0xff] }
  0x23   : > { %858 = vmatmul.mubr.msk.f32.gmra.mrb[4].mxu0 %vm231_vm1, %v198_v7  ;;  %v224_v28 = vld [vmem:[%s1118_s29 + $0xe0] sm:$0xff]  ;;  %v225_v30 = vld [vmem:[%s1118_s29 + $0xe8] sm:$0xff]  ;;  %v226_v32 = vld [vmem:[%s1118_s29 + $0xf0] sm:$0xff] }
  0x24   : > { %415 = vmatprep.mubr.f32.mxu0 %v1035_v2  ;;  %874 = vmatmul.mubr.msk.f32.gmra.mrb[4].mxu1 %vm231_vm1, %v214_v8  ;;  %v211_v33 = vld [vmem:[%s1118_s29 + $0x78] sm:$0xff] }
  0x25   : > { %511 = vmatprep.mubr.f32.mxu1 %v1035_v2  ;;  %v227_v34 = vld [vmem:[%s1118_s29 + $0xf8] sm:$0xff] }
  0x27   : > { %859 = vmatmul.mubr.msk.f32.gmra.mrb[6].mxu0 %vm231_vm1, %v199_v9 }
  0x28   : > { %421 = vmatprep.mubr.f32.mxu0 %v1035_v2  ;;  %875 = vmatmul.mubr.msk.f32.gmra.mrb[6].mxu1 %vm231_vm1, %v215_v10 }
  0x29   : > { %517 = vmatprep.mubr.f32.mxu1 %v1035_v2 }
  0x2b   : > { %860 = vmatmul.mubr.msk.f32.gmra.mrb[8].mxu0 %vm231_vm1, %v200_v11 }
  0x2c   : > { %427 = vmatprep.mubr.f32.mxu0 %v1035_v2  ;;  %876 = vmatmul.mubr.msk.f32.gmra.mrb[8].mxu1 %vm231_vm1, %v216_v12 }
  0x2d   : > { %523 = vmatprep.mubr.f32.mxu1 %v1035_v2 }
  0x2f   : > { %861 = vmatmul.mubr.msk.f32.gmra.mrb[10].mxu0 %vm231_vm1, %v201_v13 }
  0x30   : > { %433 = vmatprep.mubr.f32.mxu0 %v1035_v2  ;;  %877 = vmatmul.mubr.msk.f32.gmra.mrb[10].mxu1 %vm231_vm1, %v217_v14 }
  0x31   : > { %529 = vmatprep.mubr.f32.mxu1 %v1035_v2 }
  0x33   : > { %862 = vmatmul.mubr.msk.f32.gmra.mrb[12].mxu0 %vm231_vm1, %v202_v15 }
  0x34   : > { %439 = vmatprep.mubr.f32.mxu0 %v1035_v2  ;;  %878 = vmatmul.mubr.msk.f32.gmra.mrb[12].mxu1 %vm231_vm1, %v218_v16 }
  0x35   : > { %535 = vmatprep.mubr.f32.mxu1 %v1035_v2 }
  0x37   : > { %863 = vmatmul.mubr.msk.f32.gmra.mrb[14].mxu0 %vm231_vm1, %v203_v17 }
  0x38   : > { %445 = vmatprep.mubr.f32.mxu0 %v1035_v2  ;;  %879 = vmatmul.mubr.msk.f32.gmra.mrb[14].mxu1 %vm231_vm1, %v219_v18 }
  0x39   : > { %541 = vmatprep.mubr.f32.mxu1 %v1035_v2 }
  0x3b   : > { %864 = vmatmul.mubr.msk.f32.gmra.mrb[16].mxu0 %vm231_vm1, %v204_v19 }
  0x3c   : > { %451 = vmatprep.mubr.f32.mxu0 %v1035_v2  ;;  %880 = vmatmul.mubr.msk.f32.gmra.mrb[16].mxu1 %vm231_vm1, %v220_v20 }
  0x3d   : > { %547 = vmatprep.mubr.f32.mxu1 %v1035_v2 }
  0x3f   : > { %865 = vmatmul.mubr.msk.f32.gmra.mrb[18].mxu0 %vm231_vm1, %v205_v21 }
  0x40   : > { %457 = vmatprep.mubr.f32.mxu0 %v1035_v2  ;;  %881 = vmatmul.mubr.msk.f32.gmra.mrb[18].mxu1 %vm231_vm1, %v221_v22 }
  0x41   : > { %553 = vmatprep.mubr.f32.mxu1 %v1035_v2 }
  0x43   : > { %866 = vmatmul.mubr.msk.f32.gmra.mrb[20].mxu0 %vm231_vm1, %v206_v23 }
  0x44   : > { %463 = vmatprep.mubr.f32.mxu0 %v1035_v2  ;;  %882 = vmatmul.mubr.msk.f32.gmra.mrb[20].mxu1 %vm231_vm1, %v222_v24 }
  0x45   : > { %559 = vmatprep.mubr.f32.mxu1 %v1035_v2 }
  0x47   : > { %867 = vmatmul.mubr.msk.f32.gmra.mrb[22].mxu0 %vm231_vm1, %v207_v25 }
  0x48   : > { %469 = vmatprep.mubr.f32.mxu0 %v1035_v2  ;;  %883 = vmatmul.mubr.msk.f32.gmra.mrb[22].mxu1 %vm231_vm1, %v223_v26 }
  0x49   : > { %565 = vmatprep.mubr.f32.mxu1 %v1035_v2 }
  0x4b   : > { %868 = vmatmul.mubr.msk.f32.gmra.mrb[24].mxu0 %vm231_vm1, %v208_v27 }
  0x4c   : > { %475 = vmatprep.mubr.f32.mxu0 %v1035_v2  ;;  %884 = vmatmul.mubr.msk.f32.gmra.mrb[24].mxu1 %vm231_vm1, %v224_v28 }
  0x4d   : > { %571 = vmatprep.mubr.f32.mxu1 %v1035_v2 }
  0x4f   : > { %869 = vmatmul.mubr.msk.f32.gmra.mrb[26].mxu0 %vm231_vm1, %v209_v29 }
  0x50   : > { %481 = vmatprep.mubr.f32.mxu0 %v1035_v2  ;;  %885 = vmatmul.mubr.msk.f32.gmra.mrb[26].mxu1 %vm231_vm1, %v225_v30 }
  0x51   : > { %577 = vmatprep.mubr.f32.mxu1 %v1035_v2 }
  0x53   : > { %870 = vmatmul.mubr.msk.f32.gmra.mrb[28].mxu0 %vm231_vm1, %v210_v31 }
  0x54   : > { %487 = vmatprep.mubr.f32.mxu0 %v1035_v2  ;;  %886 = vmatmul.mubr.msk.f32.gmra.mrb[28].mxu1 %vm231_vm1, %v226_v32 }
  0x55   : > { %583 = vmatprep.mubr.f32.mxu1 %v1035_v2 }
  0x57   : > { %871 = vmatmul.mubr.msk.f32.gmra.mrb[30].mxu0 %vm231_vm1, %v211_v33 }
  0x58   : > { %887 = vmatmul.mubr.msk.f32.gmra.mrb[30].mxu1 %vm231_vm1, %v227_v34 }
  0xee   : > { %v399_v37 = vpop.f32.mrb[0].mxu0 }
  0xef   : > { %v401_v38 = vpop.f32.mrb[1].mxu0  ;;  %v1228_v39 = vpop.f32.mrb[0].mxu1  ;;  %v590_v42 = vmax.f32 %v399_v37, 0.0 }
  0xf0   : > { %v1230_v40 = vpop.f32.mrb[1].mxu1  ;;  %v591_v45 = vmax.f32 %v401_v38, 0.0 }
  0xf2   : > { %v405_v41 = vpop.f32.mrb[2].mxu0 }
  0xf3   : > { %v592_v43 = vmax.f32 %v405_v41, 0.0  ;;  %v407_v44 = vpop.f32.mrb[3].mxu0  ;;  %v1232_v47 = vpop.f32.mrb[2].mxu1 }
  0xf4   : > { %v593_v46 = vmax.f32 %v407_v44, 0.0  ;;  %v1234_v49 = vpop.f32.mrb[3].mxu1 }
  0xf5   : > { %v655_v48 = vadd.f32 %v592_v43, %v590_v42 }
  0xf6   : > { %v692_v50 = vadd.f32 %v593_v46, %v591_v45  ;;  %v411_v51 = vpop.f32.mrb[4].mxu0 }
  0xf7   : > { %v594_v52 = vmax.f32 %v411_v51, 0.0  ;;  %v413_v53 = vpop.f32.mrb[5].mxu0  ;;  %v1236_v55 = vpop.f32.mrb[4].mxu1 }
  0xf8   : > { %v595_v54 = vmax.f32 %v413_v53, 0.0  ;;  %v1238_v57 = vpop.f32.mrb[5].mxu1 }
  0xf9   : > { %v656_v56 = vadd.f32 %v655_v48, %v594_v52 }
  0xfa   : > { %v693_v58 = vadd.f32 %v692_v50, %v595_v54  ;;  %v417_v59 = vpop.f32.mrb[6].mxu0 }
  0xfb   : > { %v596_v60 = vmax.f32 %v417_v59, 0.0  ;;  %v419_v61 = vpop.f32.mrb[7].mxu0  ;;  %v1240_v63 = vpop.f32.mrb[6].mxu1 }
  0xfc   : > { %v597_v62 = vmax.f32 %v419_v61, 0.0  ;;  %v1242_v1 = vpop.f32.mrb[7].mxu1 }
  0xfd   : > { %v657_v0 = vadd.f32 %v656_v56, %v596_v60 }
  0xfe   : > { %v694_v2 = vadd.f32 %v693_v58, %v597_v62  ;;  %v423_v3 = vpop.f32.mrb[8].mxu0 }
  0xff   : > { %v598_v4 = vmax.f32 %v423_v3, 0.0  ;;  %v425_v5 = vpop.f32.mrb[9].mxu0  ;;  %v1244_v7 = vpop.f32.mrb[8].mxu1 }
 0x100   : > { %v599_v6 = vmax.f32 %v425_v5, 0.0  ;;  %v1246_v9 = vpop.f32.mrb[9].mxu1 }
 0x101   : > { %v658_v8 = vadd.f32 %v657_v0, %v598_v4 }
 0x102   : > { %v695_v10 = vadd.f32 %v694_v2, %v599_v6  ;;  %v429_v11 = vpop.f32.mrb[10].mxu0 }
 0x103   : > { %v600_v12 = vmax.f32 %v429_v11, 0.0  ;;  %v431_v13 = vpop.f32.mrb[11].mxu0  ;;  %v1248_v15 = vpop.f32.mrb[10].mxu1 }
 0x104   : > { %v601_v14 = vmax.f32 %v431_v13, 0.0  ;;  %v1250_v17 = vpop.f32.mrb[11].mxu1 }
 0x105   : > { %v659_v16 = vadd.f32 %v658_v8, %v600_v12 }
 0x106   : > { %v696_v18 = vadd.f32 %v695_v10, %v601_v14  ;;  %v435_v19 = vpop.f32.mrb[12].mxu0 }
 0x107   : > { %v602_v20 = vmax.f32 %v435_v19, 0.0  ;;  %v437_v21 = vpop.f32.mrb[13].mxu0  ;;  %v1252_v23 = vpop.f32.mrb[12].mxu1 }
 0x108   : > { %v603_v22 = vmax.f32 %v437_v21, 0.0  ;;  %v1254_v25 = vpop.f32.mrb[13].mxu1 }
 0x109   : > { %v660_v24 = vadd.f32 %v659_v16, %v602_v20 }
 0x10a   : > { %v697_v26 = vadd.f32 %v696_v18, %v603_v22  ;;  %v441_v27 = vpop.f32.mrb[14].mxu0 }
 0x10b   : > { %v604_v28 = vmax.f32 %v441_v27, 0.0  ;;  %v443_v29 = vpop.f32.mrb[15].mxu0  ;;  %v1256_v31 = vpop.f32.mrb[14].mxu1 }
 0x10c   : > { %v605_v30 = vmax.f32 %v443_v29, 0.0  ;;  %v1258_v33 = vpop.f32.mrb[15].mxu1 }
 0x10d   : > { %v661_v32 = vadd.f32 %v660_v24, %v604_v28 }
 0x10e   : > { %v698_v34 = vadd.f32 %v697_v26, %v605_v30  ;;  %v447_v37 = vpop.f32.mrb[16].mxu0 }
 0x10f   : > { %v606_v38 = vmax.f32 %v447_v37, 0.0  ;;  %v449_v41 = vpop.f32.mrb[17].mxu0  ;;  %v1260_v43 = vpop.f32.mrb[16].mxu1 }
 0x110   : > { %v607_v42 = vmax.f32 %v449_v41, 0.0  ;;  %v1262_v45 = vpop.f32.mrb[17].mxu1 }
 0x111   : > { %v662_v44 = vadd.f32 %v661_v32, %v606_v38 }
 0x112   : > { %v699_v46 = vadd.f32 %v698_v34, %v607_v42  ;;  %v453_v48 = vpop.f32.mrb[18].mxu0 }
 0x113   : > { %v608_v50 = vmax.f32 %v453_v48, 0.0  ;;  %v455_v51 = vpop.f32.mrb[19].mxu0  ;;  %v1264_v53 = vpop.f32.mrb[18].mxu1 }
 0x114   : > { %v609_v52 = vmax.f32 %v455_v51, 0.0  ;;  %v1266_v56 = vpop.f32.mrb[19].mxu1 }
 0x115   : > { %v663_v54 = vadd.f32 %v662_v44, %v608_v50 }
 0x116   : > { %v700_v58 = vadd.f32 %v699_v46, %v609_v52  ;;  %v459_v59 = vpop.f32.mrb[20].mxu0 }
 0x117   : > { %v610_v60 = vmax.f32 %v459_v59, 0.0  ;;  %v461_v61 = vpop.f32.mrb[21].mxu0  ;;  %v1268_v0 = vpop.f32.mrb[20].mxu1 }
 0x118   : > { %v611_v62 = vmax.f32 %v461_v61, 0.0  ;;  %v1270_v3 = vpop.f32.mrb[21].mxu1 }
 0x119   : > { %v664_v2 = vadd.f32 %v663_v54, %v610_v60 }
 0x11a   : > { %v701_v4 = vadd.f32 %v700_v58, %v611_v62  ;;  %v465_v5 = vpop.f32.mrb[22].mxu0  ;;  %v622_v62 = vmax.f32 %v1228_v39, 0.0  ;;  %v628_v39 = vmax.f32 %v1240_v63, 0.0  ;;  %v635_v63 = vmax.f32 %v1254_v25, 0.0 }
 0x11b   : > { %v612_v6 = vmax.f32 %v465_v5, 0.0  ;;  %v467_v8 = vpop.f32.mrb[23].mxu0  ;;  %v1272_v11 = vpop.f32.mrb[22].mxu1  ;;  %v623_v5 = vmax.f32 %v1230_v40, 0.0  ;;  %v630_v40 = vmax.f32 %v1244_v7, 0.0  ;;  %v637_v7 = vmax.f32 %v1258_v33, 0.0 }
 0x11c   : > { %v613_v10 = vmax.f32 %v467_v8, 0.0  ;;  %v1274_v13 = vpop.f32.mrb[23].mxu1  ;;  %v624_v8 = vmax.f32 %v1232_v47, 0.0  ;;  %v631_v47 = vmax.f32 %v1246_v9, 0.0  ;;  %v638_v9 = vmax.f32 %v1260_v43, 0.0 }
 0x11d   : > { %v665_v12 = vadd.f32 %v664_v2, %v612_v6 }
 0x11e   : > { %v702_v14 = vadd.f32 %v701_v4, %v613_v10  ;;  %v471_v16 = vpop.f32.mrb[24].mxu0 }
 0x11f   : > { %v614_v18 = vmax.f32 %v471_v16, 0.0  ;;  %v473_v19 = vpop.f32.mrb[25].mxu0  ;;  %v1276_v21 = vpop.f32.mrb[24].mxu1  ;;  %v626_v16 = vmax.f32 %v1236_v55, 0.0  ;;  %v633_v55 = vmax.f32 %v1250_v17, 0.0 }
 0x120   : > { %v615_v20 = vmax.f32 %v473_v19, 0.0  ;;  %v1278_v24 = vpop.f32.mrb[25].mxu1  ;;  %v627_v19 = vmax.f32 %v1238_v57, 0.0  ;;  %v634_v57 = vmax.f32 %v1252_v23, 0.0 }
 0x121   : > { %v666_v22 = vadd.f32 %v665_v12, %v614_v18  ;;  %v625_v12 = vmax.f32 %v1234_v49, 0.0  ;;  %v632_v49 = vmax.f32 %v1248_v15, 0.0  ;;  %v639_v15 = vmax.f32 %v1262_v45, 0.0 }
 0x122   : > { %v703_v26 = vadd.f32 %v702_v14, %v615_v20  ;;  %v477_v27 = vpop.f32.mrb[26].mxu0 }
 0x123   : > { %v616_v28 = vmax.f32 %v477_v27, 0.0  ;;  %v479_v29 = vpop.f32.mrb[27].mxu0  ;;  %v1280_v32 = vpop.f32.mrb[26].mxu1 }
 0x124   : > { %v617_v30 = vmax.f32 %v479_v29, 0.0  ;;  %v1282_v37 = vpop.f32.mrb[27].mxu1 }
 0x125   : > { %v667_v34 = vadd.f32 %v666_v22, %v616_v28 }
 0x126   : > { %v704_v38 = vadd.f32 %v703_v26, %v617_v30  ;;  %v483_v41 = vpop.f32.mrb[28].mxu0  ;;  %v629_v26 = vmax.f32 %v1242_v1, 0.0  ;;  %v636_v1 = vmax.f32 %v1256_v31, 0.0 }
 0x127   : > { %v618_v42 = vmax.f32 %v483_v41, 0.0  ;;  %v485_v44 = vpop.f32.mrb[29].mxu0  ;;  %v1284_v48 = vpop.f32.mrb[28].mxu1 }
 0x128   : > { %v619_v46 = vmax.f32 %v485_v44, 0.0  ;;  %v1286_v51 = vpop.f32.mrb[29].mxu1 }
 0x129   : > { %v668_v50 = vadd.f32 %v667_v34, %v618_v42 }
 0x12a   : > { %v705_v52 = vadd.f32 %v704_v38, %v619_v46  ;;  %v489_v54 = vpop.f32.mrb[30].mxu0 }
 0x12b   : > { %v620_v58 = vmax.f32 %v489_v54, 0.0  ;;  %v491_v59 = vpop.f32.mrb[31].mxu0  ;;  %v1288_v61 = vpop.f32.mrb[30].mxu1  ;;  %v641_v54 = vmax.f32 %v1266_v56, 0.0  ;;  %v648_v56 = vmax.f32 %v1280_v32, 0.0 }
 0x12c   : > { %v621_v60 = vmax.f32 %v491_v59, 0.0  ;;  %v1291_v4 = vpop.f32.mrb[31].mxu1  ;;  %v643_v59 = vmax.f32 %v1270_v3, 0.0  ;;  %v650_v3 = vmax.f32 %v1284_v48, 0.0 }
 0x12d   : > { %v669_v2 = vadd.f32 %v668_v50, %v620_v58  ;;  %v642_v58 = vmax.f32 %v1268_v0, 0.0  ;;  %v649_v0 = vmax.f32 %v1282_v37, 0.0  ;;  %v1036_v37 = vmov 1966171168  }
 0x12e   : > { %v706_v6 = vadd.f32 %v705_v52, %v621_v60  ;;  %v640_v52 = vmax.f32 %v1264_v53, 0.0  ;;  %v644_v60 = vmax.f32 %v1272_v11, 0.0  ;;  %v647_v53 = vmax.f32 %v1278_v24, 0.0 }
 0x12f   : > { %v670_v10 = vadd.f32 %v669_v2, %v622_v62  ;;  %v645_v62 = vmax.f32 %v1274_v13, 0.0  ;;  %v646_v2 = vmax.f32 %v1276_v21, 0.0  ;;  %v652_v11 = vmax.f32 %v1288_v61, 0.0 }
 0x130   : > { %v707_v14 = vadd.f32 %v706_v6, %v623_v5  ;;  %v651_v13 = vmax.f32 %v1286_v51, 0.0 }
 0x131   : > { %v671_v18 = vadd.f32 %v670_v10, %v624_v8 }
 0x132   : > { %v708_v20 = vadd.f32 %v707_v14, %v625_v12  ;;  %v653_v14 = vmax.f32 %v1291_v4, 0.0  ;;  %v736_v4 = vshrl.u32 %v191_v35, 7 }
 0x133   : > { %v672_v22 = vadd.f32 %v671_v18, %v626_v16 }
 0x134   : > { %v709_v27 = vadd.f32 %v708_v20, %v627_v19 }
 0x135   : > { %v673_v28 = vadd.f32 %v672_v22, %v628_v39  ;;  %v733_v22 = vunpack.c.l.s4 %v1036_v37 }
 0x136   : > { %v710_v29 = vadd.f32 %v709_v27, %v629_v26 }
 0x137   : > { %v674_v30 = vadd.f32 %v673_v28, %v630_v40  ;;  %v734_v51 = vunpack.c.0.s8 %v733_v22 }
 0x138   : > { %v711_v34 = vadd.f32 %v710_v29, %v631_v47 }
 0x139   : > { %v675_v38 = vadd.f32 %v674_v30, %v632_v49  ;;  %v737_v49 = vsub.s32 %v734_v51, %v736_v4 }
 0x13a   : > { %v712_v41 = vadd.f32 %v711_v34, %v633_v55  ;;  %v654_v34 = vld [vmem:[%s1222_s4] sm:$0x3] }
 0x13b   : > { %v676_v42 = vadd.f32 %v675_v38, %v634_v57 }
 0x13c   : > { %v713_v44 = vadd.f32 %v712_v41, %v635_v63 }
 0x13d   : > { %v677_v46 = vadd.f32 %v676_v42, %v636_v1 }
 0x13e   : > { %v714_v50 = vadd.f32 %v713_v44, %v637_v7 }
 0x13f   : > { %v678_v17 = vadd.f32 %v677_v46, %v638_v9 }
 0x140   : > { %v715_v23 = vadd.f32 %v714_v50, %v639_v15 }
 0x141   : > { %v679_v25 = vadd.f32 %v678_v17, %v640_v52 }
 0x142   : > { %v716_v31 = vadd.f32 %v715_v23, %v641_v54 }
 0x143   : > { %v680_v33 = vadd.f32 %v679_v25, %v642_v58 }
 0x144   : > { %v717_v43 = vadd.f32 %v716_v31, %v643_v59 }
 0x145   : > { %v681_v45 = vadd.f32 %v680_v33, %v644_v60 }
 0x146   : > { %v718_v5 = vadd.f32 %v717_v43, %v645_v62 }
 0x147   : > { %v682_v6 = vadd.f32 %v681_v45, %v646_v2 }
 0x148   : > { %v719_v8 = vadd.f32 %v718_v5, %v647_v53 }
 0x149   : > { %v683_v10 = vadd.f32 %v682_v6, %v648_v56 }
 0x14a   : > { %v720_v12 = vadd.f32 %v719_v8, %v649_v0 }
 0x14b   : > { %v684_v21 = vadd.f32 %v683_v10, %v650_v3 }
 0x14c   : > { %v721_v16 = vadd.f32 %v720_v12, %v651_v13 }
 0x14d   : > { %v685_v18 = vadd.f32 %v684_v21, %v652_v11 }
 0x14e   : > { %v722_v24 = vadd.f32 %v721_v16, %v653_v14 }
 0x14f   : > { %v686_v19 = vrot.slane %v685_v18, 4 }
 0x150   : > { %v723_v20 = vrot.slane %v722_v24, 4 }
 0x151   : > { %v687_v32 = vadd.f32 %v686_v19, %v685_v18 }
 0x152   : > { %v724_v39 = vadd.f32 %v723_v20, %v722_v24 }
 0x153   : > { %v688_v48 = vrot.slane %v687_v32, 2 }
 0x154   : > { %v725_v61 = vrot.slane %v724_v39, 2 }
 0x155   : > { %v689_v26 = vadd.f32 %v688_v48, %v687_v32 }
 0x156   : > { %v726_v27 = vadd.f32 %v725_v61, %v724_v39 }
 0x157   : > { %v690_v40 = vrot.slane %v689_v26, 1 }
 0x158   : > { %v727_v28 = vrot.slane %v726_v27, 1 }
 0x159   : > { %v691_v47 = vadd.f32 %v690_v40, %v689_v26 }
 0x15a   : > { %v728_v29 = vadd.f32 %v727_v28, %v726_v27 }
 0x15c   : > { %v731_v30 = vcombine.low %v691_v47, %v728_v29 }
 0x15e   : > { %v738_v55 = vrot.slane %v731_v30, %v737_v49 }
 0x160   : > { %v745_v57 = vrot.slane %v738_v55, %v737_v49 }
 0x162   : > { %v747_v38 = vadd.f32 %v745_v57, %v654_v34 }
 0x164   : > { %752 = vst.msk [vmem:[%s1222_s4] sm:$0x3] %vm1218_vm2, %v747_v38 }
 0x165   : > { %968 = shalt.err (!%p965_p5)
}
 0x166   : > { %s969_s24 = scalar_lea.hbm %s1331_s15, 32  ;;  %s973_s27 = scalar_lea.hbm %s1385_s2, 64 }
 0x167   : > { %p970_p6 = scmp.ne.s32.totalorder %s1331_s15, %s969_s24  ;;  %p974_p10 = scmp.lt.u32.totalorder %s1331_s15, %s1385_s2 }
 0x168   : > { %p975_p11 = scmp.lt.u32.totalorder %s973_s27, %s969_s24  ;;  %p977_p13 = scmp.lt.u32.totalorder %s969_s24, %s1331_s15 }
 0x169   : > { %p971_p7 = pnand %p970_p6, %p1093_p4 }
 0x16a   : > { %p976_p12 = por %p975_p11, %p974_p10 }
 0x16b   : > { %p972_p9 = pneg %p971_p7 }
 0x16c   : > { %p978_p0 = por %p977_p13, %p976_p12 }
 0x16e   : > { %p979_p1 = pnand %p978_p0, %p972_p9 }
 0x170   : > { %982 = shalt.err (!%p979_p1)
}
 0x171   : > { %897 = dma.vmem_to_hbm [thread:$0]  (%p1093_p4), %s1333_s6, 32, %s1331_s15, %s754_s16  }
 0x172 PF: > { %p903_p2 = scmp.ge.s32.totalorder %s1033_s14, 2  ;;  %s781_s30 = sand.u32 1, %s1013_s9  }
 0x173   : > { %s782_s3 = scalar_lea.sflag [#allocation3], %s781_s30 }
 0x174   : > { %p900_p3 = pnand %p903_p2, %p1100_p8 }
 0x176   : > { %1008 = dma.done.wait (!%p900_p3), %s782_s3, 32  }
 0x177   : > { %1010 = vsyncadd (!%p900_p3), %s782_s3, 4294967264  ;;  %s15_s14 = sadd.s32 1, %s1033_s14   ;;  %s1390_s9 = smov %s1017_s10 }
 0x178   : > { %p12_p5 = scmp.ge.s32.totalorder %s15_s14, 4   ;;  %s1391_s10 = smov %s1021_s11 }
 0x179   : > { %s1392_s11 = smov %s1106_s22  ;;  %s1393_s12 = smov %s1029_s13 }
 0x17a   : > { %s1394_s13 = smov %s1396_s17  ;;  %14 = sbr.rel (!%p12_p5) target bundleno = 4 (0x4), region = 67 }
 0x181   :  { %787 = vsyncpa [#allocation3], 1 }
 0x182   :  { %789 = vsyncpa [#allocation3 + $0x1], 1 }

</bundles_post_ra>
